<compile_context>
chip_gen: v7x
topology: tpu7x:2x2x1
jax: 0.10.0
libtpu: 0.0.40
codegen_flags: <defaults>
</compile_context>

<pallas_src>
import functools

import jax
import jax.numpy as jnp
from jax.experimental import pallas as pl
from jax.experimental.pallas import tpu as pltpu


# ------------------------- generation-aware config ---------------------------

def _tpu_vmem_budget_bytes():
    """Scoped-VMEM limit: ~75% of physical, capped at 100 MiB (v5e/v6e have
    128 MiB, v7x only 64 MiB)."""
    cap = None
    try:
        cap = int(pltpu.get_tpu_info().vmem_capacity_bytes)
    except Exception:
        cap = None
    if cap is None:
        try:
            kind = jax.devices()[0].device_kind.lower()
            cap = 64 * 1024 * 1024 if "v7" in kind else 128 * 1024 * 1024
        except Exception:
            cap = 64 * 1024 * 1024
    return min(int(cap * 0.75), 100 * 1024 * 1024)


def _use_bf16_exp():
    """bf16 EUP exists on v6e/v7x; keep f32 transcendentals on older chips."""
    try:
        kind = jax.devices()[0].device_kind.lower()
    except Exception:
        return False
    return not any(tag in kind for tag in ("v2", "v3", "v4", "v5"))


_VMEM_LIMIT_BYTES = _tpu_vmem_budget_bytes()
_EXP_DTYPE = jnp.bfloat16 if _use_bf16_exp() else jnp.float32


# ----------------------------- Pallas kernels --------------------------------

def _matmul_kernel(*refs, activation, has_bias, has_res, has_ln, eps):
    """Tiled matmul, f32 accumulator; optional fused LN prologue and
    bias / quick_gelu / residual epilogue."""
    it = iter(refs)
    x_ref = next(it)
    w_ref = next(it)
    g_ref = next(it) if has_ln else None
    bln_ref = next(it) if has_ln else None
    b_ref = next(it) if has_bias else None
    r_ref = next(it) if has_res else None
    o_ref = next(it)
    acc_ref = next(it)

    @pl.when(pl.program_id(2) == 0)
    def _():
        acc_ref[...] = jnp.zeros_like(acc_ref)

    x = x_ref[...]
    if has_ln:
        # LayerNorm fused into the matmul prologue (requires tk == K).
        xf = x.astype(jnp.float32)
        mu = jnp.mean(xf, axis=-1, keepdims=True)
        var = jnp.mean(jnp.square(xf - mu), axis=-1, keepdims=True)
        xf = (xf - mu) * jax.lax.rsqrt(var + eps)
        xf = xf * g_ref[...].astype(jnp.float32) + bln_ref[...].astype(jnp.float32)
        x = xf.astype(x_ref.dtype)

    # bf16 x bf16 -> f32 accumulate on the MXU (no operand upcast).
    acc_ref[...] += jnp.dot(x, w_ref[...], preferred_element_type=jnp.float32)

    @pl.when(pl.program_id(2) == pl.num_programs(2) - 1)
    def _():
        y = acc_ref[...]
        if has_bias:
            y = y + b_ref[...].astype(jnp.float32)
        if activation == "quick_gelu":
            # CLIP quick_gelu: x * sigmoid(1.702 * x)
            y = y * jax.nn.sigmoid(1.702 * y)
        if has_res:
            y = y + r_ref[...].astype(jnp.float32)
        o_ref[...] = y.astype(o_ref.dtype)


def _layernorm_kernel(x_ref, g_ref, b_ref, o_ref, *, eps):
    x = x_ref[...].astype(jnp.float32)
    mu = jnp.mean(x, axis=-1, keepdims=True)
    var = jnp.mean(jnp.square(x - mu), axis=-1, keepdims=True)
    y = (x - mu) * jax.lax.rsqrt(var + eps)
    y = y * g_ref[...].astype(jnp.float32) + b_ref[...].astype(jnp.float32)
    o_ref[...] = y.astype(o_ref.dtype)


def _attention_kernel(q_ref, k_ref, v_ref, o_ref, *, n_heads, head_dim, scale,
                      exp_dtype):
    """Blocks are (1, S, n_heads*head_dim); per-head softmax(QK^T)V, lane-dense
    concatenated store."""
    q_all = q_ref[0]
    k_all = k_ref[0]
    v_all = v_ref[0]
    outs = []
    for h in range(n_heads):                      # static unroll over packed heads
        lo = h * head_dim
        q = q_all[:, lo:lo + head_dim]
        k = k_all[:, lo:lo + head_dim]
        v = v_all[:, lo:lo + head_dim]
        s = jax.lax.dot_general(q, k, (((1,), (1,)), ((), ())),
                                preferred_element_type=jnp.float32) * scale
        m = jnp.max(s, axis=-1, keepdims=True)
        p = jnp.exp((s - m).astype(exp_dtype))    # bf16 exp on v6e/v7x
        denom = jnp.sum(p.astype(jnp.float32), axis=-1, keepdims=True)
        inv = pl.reciprocal(denom, approx=True)
        o = jax.lax.dot_general(p.astype(v.dtype), v, (((1,), (0,)), ((), ())),
                                preferred_element_type=jnp.float32)
        outs.append((o * inv).astype(o_ref.dtype))
    o_ref[0] = outs[0] if n_heads == 1 else jnp.concatenate(outs, axis=-1)


# ------------------------------- wrappers -------------------------------------

def _pick_k_tile(K, pref=1024):
    """K tile must divide K exactly (reduction over padded garbage is unsafe)."""
    if K <= pref:
        return K
    for cand in (pref, 512, 256, 128):
        if K % cand == 0:
            return cand
    return K  # fallback: no K tiling


def pallas_layernorm(x, gamma, beta, eps=1e-5, block_rows=512):
    """x: (M, D), gamma/beta: (D,) -> (M, D). Row-tiled, HBM-bandwidth bound."""
    M, D = x.shape
    tr = M if M <= block_rows else (block_rows // 8) * 8
    kern = functools.partial(_layernorm_kernel, eps=eps)
    return pl.pallas_call(
        kern,
        out_shape=jax.ShapeDtypeStruct((M, D), x.dtype),
        grid=(pl.cdiv(M, tr),),
        in_specs=[
            pl.BlockSpec((tr, D), lambda i: (i, 0)),
            pl.BlockSpec((1, D), lambda i: (0, 0)),
            pl.BlockSpec((1, D), lambda i: (0, 0)),
        ],
        out_specs=pl.BlockSpec((tr, D), lambda i: (i, 0)),
        compiler_params=pltpu.CompilerParams(
            dimension_semantics=("parallel",),
            vmem_limit_bytes=_VMEM_LIMIT_BYTES),
    )(x, gamma.reshape(1, D), beta.reshape(1, D))


def pallas_linear(x, w, b=None, res=None, activation=None, ln=None, tn_pref=512):
    """y = [LN](x) @ w [+ b] [quick_gelu] [+ res].

    x: (M, K), w: (K, N), b: (N,) or None, res: (M, N) or None,
    ln: (gamma, beta, eps) fused into the prologue (requires one K tile).
    """
    M, K = x.shape
    K2, N = w.shape
    assert K == K2

    has_ln = ln is not None
    if has_ln and K > 2048:
        # Prologue LN needs the full contraction axis resident; fall back.
        g, bb, leps = ln
        x = pallas_layernorm(x, g, bb, leps)
        has_ln, ln = False, None

    tk = K if has_ln else _pick_k_tile(K)
    # Lane-dense N tile (multiple of 128 or full N); 512 keeps >=2 parallel
    # j-blocks at real CLIP widths so both v7x TensorCores are busy.
    tn = N if N <= tn_pref else (tn_pref // 128) * 128

    has_bias = b is not None
    has_res = res is not None
    esz = x.dtype.itemsize

    # Row tile: cover the full M = B*S extent (streams each weight tile exactly
    # once) unless the double-buffered working set would blow the VMEM budget.
    def _vmem_est(tm_):
        by = 2 * tm_ * tk * esz            # x tiles (double-buffered)
        by += 2 * tk * tn * esz            # w tiles
        by += 2 * tm_ * tn * esz           # out tiles
        by += tm_ * tn * 4                 # f32 accumulator scratch
        if has_res:
            by += 2 * tm_ * tn * esz
        if has_ln:
            by += tm_ * tk * 4             # f32 LN temporaries
        return by

    tm = M
    budget = int(_VMEM_LIMIT_BYTES * 0.8)
    while _vmem_est(tm) > budget and tm > 256:
        tm = max(256, ((tm // 2) // 8) * 8)

    grid = (pl.cdiv(M, tm), pl.cdiv(N, tn), K // tk)

    in_specs = [
        pl.BlockSpec((tm, tk), lambda i, j, k: (i, k)),
        pl.BlockSpec((tk, tn), lambda i, j, k: (k, j)),
    ]
    args = [x, w]
    eps = 0.0
    if has_ln:
        g, bb, eps = ln
        in_specs.append(pl.BlockSpec((1, tk), lambda i, j, k: (0, k)))
        in_specs.append(pl.BlockSpec((1, tk), lambda i, j, k: (0, k)))
        args += [g.reshape(1, K), bb.reshape(1, K)]
    if has_bias:
        in_specs.append(pl.BlockSpec((1, tn), lambda i, j, k: (0, j)))
        args.append(b.reshape(1, N))
    if has_res:
        in_specs.append(pl.BlockSpec((tm, tn), lambda i, j, k: (i, j)))
        args.append(res)

    kern = functools.partial(_matmul_kernel, activation=activation,
                             has_bias=has_bias, has_res=has_res,
                             has_ln=has_ln, eps=eps)
    return pl.pallas_call(
        kern,
        out_shape=jax.ShapeDtypeStruct((M, N), x.dtype),
        grid=grid,
        in_specs=in_specs,
        out_specs=pl.BlockSpec((tm, tn), lambda i, j, k: (i, j)),
        scratch_shapes=[pltpu.VMEM((tm, tn), jnp.float32)],
        compiler_params=pltpu.CompilerParams(
            dimension_semantics=("parallel", "parallel", "arbitrary"),
            vmem_limit_bytes=_VMEM_LIMIT_BYTES),
    )(*args)


def pallas_attention(qkv, B, S, heads, head_dim, scale):
    """qkv: (B*S, 3*D) fused projection output -> (B*S, D) attention output.

    q/k/v head-blocks are sliced straight out of the fused qkv activation via
    BlockSpec index maps and the output is written directly in (B*S, D) layout
    (no JAX-side head split/merge transposes)."""
    D = heads * head_dim
    qkv3 = qkv.reshape(B, S, 3 * D)                 # free reshape

    # Smallest head-block whose lane width is a multiple of 128 (2 heads for
    # real CLIP head_dim=64); else process all heads of a batch per step.
    hblk = heads
    for cand in range(1, heads + 1):
        if heads % cand == 0 and (cand * head_dim) % 128 == 0:
            hblk = cand
            break
    W = hblk * head_dim
    n_hb = heads // hblk

    kern = functools.partial(_attention_kernel, n_heads=hblk, head_dim=head_dim,
                             scale=scale, exp_dtype=_EXP_DTYPE)
    out_shape = jax.ShapeDtypeStruct((B, S, D), qkv.dtype)

    if W % 128 == 0:
        # 128-lane-aligned head blocks: slice q/k/v out of the same qkv array.
        bpd = D // W  # column-blocks per projection
        q_spec = pl.BlockSpec((1, S, W), lambda b, hb: (b, 0, hb))
        k_spec = pl.BlockSpec((1, S, W), lambda b, hb: (b, 0, bpd + hb))
        v_spec = pl.BlockSpec((1, S, W), lambda b, hb: (b, 0, 2 * bpd + hb))
        o_spec = pl.BlockSpec((1, S, W), lambda b, hb: (b, 0, hb))
        out = pl.pallas_call(
            kern,
            out_shape=out_shape,
            grid=(B, n_hb),
            in_specs=[q_spec, k_spec, v_spec],
            out_specs=o_spec,
            compiler_params=pltpu.CompilerParams(
                dimension_semantics=("parallel", "parallel"),
                vmem_limit_bytes=_VMEM_LIMIT_BYTES),
        )(qkv3, qkv3, qkv3)
    else:
        # Small-model fallback (D not 128-aligned): whole-D blocks, all heads
        # of one batch element per grid step.
        q2 = qkv3[:, :, :D]
        k2 = qkv3[:, :, D:2 * D]
        v2 = qkv3[:, :, 2 * D:]
        spec = pl.BlockSpec((1, S, D), lambda b: (b, 0, 0))
        out = pl.pallas_call(
            kern,
            out_shape=out_shape,
            grid=(B,),
            in_specs=[spec, spec, spec],
            out_specs=spec,
            compiler_params=pltpu.CompilerParams(
                dimension_semantics=("parallel",),
                vmem_limit_bytes=_VMEM_LIMIT_BYTES),
        )(q2, k2, v2)
    return out.reshape(B * S, D)


# --------------------------- CLIP vision tower --------------------------------

class Config:
    image_size = 16
    patch_size = 8
    num_channels = 3
    hidden_size = 32
    num_heads = 4
    num_layers = 3
    intermediate_size = 64
    layer_norm_eps = 1e-5
    # CLIPVisionTower args
    vision_select_layer = -2
    vision_select_feature = "patch"


def init_params(cfg, key):
    """Deterministic synthetic parameters (HF CLIPVisionModel shapes, q/k/v fused)."""
    D, I = cfg.hidden_size, cfg.intermediate_size
    C, ps = cfg.num_channels, cfg.patch_size
    num_pos = (cfg.image_size // cfg.patch_size) ** 2 + 1
    wdt = jnp.bfloat16

    def nrm(k, shape, std=0.02):
        return (std * jax.random.normal(k, shape, dtype=jnp.float32)).astype(wdt)

    keys = iter(jax.random.split(key, 4 + 4 * cfg.num_layers))
    params = {
        # Conv2d(C, D, kernel=ps, stride=ps, bias=False), PyTorch layout (D, C, ps, ps)
        "patch_embed_w": nrm(next(keys), (D, C, ps, ps)),
        "class_embed": nrm(next(keys), (D,)),
        "pos_embed": nrm(next(keys), (num_pos, D)),
        "pre_ln_g": jnp.ones((D,), jnp.float32),
        "pre_ln_b": jnp.zeros((D,), jnp.float32),
        "layers": [],
    }
    for _ in range(cfg.num_layers):
        layer = {
            "ln1_g": jnp.ones((D,), jnp.float32), "ln1_b": jnp.zeros((D,), jnp.float32),
            "qkv_w": nrm(next(keys), (D, 3 * D)), "qkv_b": jnp.zeros((3 * D,), jnp.float32),
            "o_w": nrm(next(keys), (D, D)), "o_b": jnp.zeros((D,), jnp.float32),
            "ln2_g": jnp.ones((D,), jnp.float32), "ln2_b": jnp.zeros((D,), jnp.float32),
            "fc1_w": nrm(next(keys), (D, I)), "fc1_b": jnp.zeros((I,), jnp.float32),
            "fc2_w": nrm(next(keys), (I, D)), "fc2_b": jnp.zeros((D,), jnp.float32),
        }
        params["layers"].append(layer)
    return params


def clip_vision_tower_forward(images, params, cfg):
    """images: (B, C, H, W) NCHW float32.  Returns (B, num_patches, hidden)."""
    B, C, H, W = images.shape
    ps = cfg.patch_size
    D = cfg.hidden_size
    nH, nW = H // ps, W // ps
    P = nH * nW
    heads = cfg.num_heads
    Dh = D // heads
    scale = Dh ** -0.5
    S = P + 1
    eps = cfg.layer_norm_eps
    cdt = jnp.bfloat16  # inter-kernel activation dtype

    # --- patch embedding (Conv2d stride=patch as matmul) ---
    x = images.astype(cdt).reshape(B, C, nH, ps, nW, ps)
    x = jnp.transpose(x, (0, 2, 4, 1, 3, 5)).reshape(B * P, C * ps * ps)
    w_patch = params["patch_embed_w"].reshape(D, C * ps * ps).T         # (C*ps*ps, D)
    patch_embeds = pallas_linear(x, w_patch).reshape(B, P, D)

    # --- prepend CLS token, add position embeddings ---
    cls = jnp.broadcast_to(params["class_embed"].reshape(1, 1, D).astype(cdt), (B, 1, D))
    hidden = jnp.concatenate([cls, patch_embeds], axis=1)               # (B, S, D)
    hidden = hidden + params["pos_embed"][None].astype(cdt)
    hidden = hidden.reshape(B * S, D)

    # --- pre-layernorm (standalone; its output also feeds the first residual) ---
    hidden = pallas_layernorm(hidden, params["pre_ln_g"], params["pre_ln_b"], eps)

    # HF hidden_states = (embeddings, layer1_out, ..., layerN_out); only compute
    # up to the selected index (select_layer = -2 -> skip the final layer).
    n_layers = len(params["layers"])
    sel = cfg.vision_select_layer
    sel_idx = sel if sel >= 0 else n_layers + 1 + sel
    assert 0 <= sel_idx <= n_layers, (sel, n_layers)

    for layer in params["layers"][:sel_idx]:
        # --- self-attention block (ln1 fused into the qkv matmul prologue) ---
        residual = hidden
        qkv = pallas_linear(hidden, layer["qkv_w"], layer["qkv_b"],
                            ln=(layer["ln1_g"], layer["ln1_b"], eps))   # (B*S, 3D)
        attn = pallas_attention(qkv, B, S, heads, Dh, scale)            # (B*S, D)
        hidden = pallas_linear(attn, layer["o_w"], layer["o_b"], res=residual)

        # --- MLP block (ln2 fused into the fc1 matmul prologue) ---
        residual = hidden
        h1 = pallas_linear(hidden, layer["fc1_w"], layer["fc1_b"],
                           activation="quick_gelu",
                           ln=(layer["ln2_g"], layer["ln2_b"], eps))
        hidden = pallas_linear(h1, layer["fc2_w"], layer["fc2_b"], res=residual)

    # --- feature_select ---
    feats = hidden.reshape(B, S, D)
    if cfg.vision_select_feature == "patch":
        feats = feats[:, 1:]                                            # drop CLS token
    elif cfg.vision_select_feature == "cls_patch":
        pass
    else:
        raise ValueError(f"Unexpected select feature: {cfg.vision_select_feature}")
    return feats.astype(images.dtype)


if __name__ == "__main__":
    cfg = Config()
    key = jax.random.PRNGKey(0)
    k_img, k_par = jax.random.split(key)

    # NCHW images, as the PyTorch module expects
    images = jax.random.normal(
        k_img, (2, cfg.num_channels, cfg.image_size, cfg.image_size), dtype=jnp.float32)
    params = init_params(cfg, k_par)

    out = clip_vision_tower_forward(images, params, cfg)
    out = jax.block_until_ready(out)

    expected = (2, (cfg.image_size // cfg.patch_size) ** 2, cfg.hidden_size)
    assert out.shape == expected, (out.shape, expected)
    assert out.dtype == images.dtype
    assert bool(jnp.all(jnp.isfinite(out)))
    print("KERNEL_OK")
</pallas_src>

<mosaic_0001>
module attributes {stable_mosaic.version = 11 : i64} {
  func.func @_matmul_kernel(%arg0: i32, %arg1: i32, %arg2: i32, %arg3: memref<8x192xbf16, #tpu.memory_space<vmem>>, %arg4: memref<192x32xbf16, #tpu.memory_space<vmem>>, %arg5: memref<8x32xbf16, #tpu.memory_space<vmem>>, %arg6: memref<8x32xf32, #tpu.memory_space<vmem>>) attributes {dimension_semantics = [#tpu.dimension_semantics<parallel>, #tpu.dimension_semantics<parallel>, #tpu.dimension_semantics<arbitrary>], iteration_bounds = array<i64: 1, 1, 1>, scalar_prefetch = 0 : i64, scratch_operands = 1 : i64, tpu.core_type = #tpu.core_type<tc>, window_params = [{transform_indices = @transform_0, window_bounds = array<i64: 8, 192>}, {transform_indices = @transform_1, window_bounds = array<i64: 192, 32>}, {transform_indices = @transform_2, window_bounds = array<i64: 8, 32>}]} {
    %c0_i32 = arith.constant 0 : i32
    %0 = arith.cmpi eq, %arg2, %c0_i32 : i32
    %1 = arith.extui %0 : i1 to i32
    %c0_i32_0 = arith.constant 0 : i32
    %2 = arith.cmpi ne, %1, %c0_i32_0 : i32
    scf.if %2 {
      %cst_10 = arith.constant 0.000000e+00 : f32
      %12 = vector.broadcast %cst_10 : f32 to vector<8x32xf32>
      %c0_11 = arith.constant 0 : index
      %c0_12 = arith.constant 0 : index
      %13 = vector.load %arg6[%c0_11, %c0_12] : memref<8x32xf32, #tpu.memory_space<vmem>>, vector<8x32xf32>
      tpu.vector_store %arg6[%c0_11, %c0_12], %12 {strides = array<i32>} : memref<8x32xf32, #tpu.memory_space<vmem>>, vector<8x32xf32>,
    } else {
    }
    %c0 = arith.constant 0 : index
    %c0_1 = arith.constant 0 : index
    %3 = vector.load %arg3[%c0, %c0_1] : memref<8x192xbf16, #tpu.memory_space<vmem>>, vector<8x192xbf16>
    %c0_2 = arith.constant 0 : index
    %c0_3 = arith.constant 0 : index
    %4 = vector.load %arg6[%c0_2, %c0_3] : memref<8x32xf32, #tpu.memory_space<vmem>>, vector<8x32xf32>
    %c0_4 = arith.constant 0 : index
    %c0_5 = arith.constant 0 : index
    %5 = vector.load %arg4[%c0_4, %c0_5] : memref<192x32xbf16, #tpu.memory_space<vmem>>, vector<192x32xbf16>
    %cst = arith.constant dense<0.000000e+00> : vector<8x32xf32>
    %6 = tpu.matmul %3, %5, %cst {dimension_numbers = #tpu.dot_dimension_numbers<[1], [0], [0], [1], [0, 0, 1, 1], [], []>} : vector<8x192xbf16>, vector<192x32xbf16>, vector<8x32xf32> -> vector<8x32xf32>
    %7 = arith.addf %4, %6 : vector<8x32xf32>
    %c0_6 = arith.constant 0 : index
    %c0_7 = arith.constant 0 : index
    %8 = vector.load %arg6[%c0_6, %c0_7] : memref<8x32xf32, #tpu.memory_space<vmem>>, vector<8x32xf32>
    tpu.vector_store %arg6[%c0_6, %c0_7], %7 {strides = array<i32>} : memref<8x32xf32, #tpu.memory_space<vmem>>, vector<8x32xf32>,
    %c0_i32_8 = arith.constant 0 : i32
    %9 = arith.cmpi eq, %arg2, %c0_i32_8 : i32
    %10 = arith.extui %9 : i1 to i32
    %c0_i32_9 = arith.constant 0 : i32
    %11 = arith.cmpi ne, %10, %c0_i32_9 : i32
    scf.if %11 {
      %c0_10 = arith.constant 0 : index
      %c0_11 = arith.constant 0 : index
      %12 = vector.load %arg6[%c0_10, %c0_11] : memref<8x32xf32, #tpu.memory_space<vmem>>, vector<8x32xf32>
      %13 = arith.truncf %12 : vector<8x32xf32> to vector<8x32xbf16>
      %c0_12 = arith.constant 0 : index
      %c0_13 = arith.constant 0 : index
      %14 = vector.load %arg5[%c0_12, %c0_13] : memref<8x32xbf16, #tpu.memory_space<vmem>>, vector<8x32xbf16>
      tpu.vector_store %arg5[%c0_12, %c0_13], %13 {strides = array<i32>} : memref<8x32xbf16, #tpu.memory_space<vmem>>, vector<8x32xbf16>,
    } else {
    }
    return
  }
  func.func @transform_0(%arg0: i32, %arg1: i32, %arg2: i32) -> (i32, i32) {
    %c0_i32 = arith.constant 0 : i32
    return %arg0, %arg2 : i32, i32
  }
  func.func @transform_1(%arg0: i32, %arg1: i32, %arg2: i32) -> (i32, i32) {
    %c0_i32 = arith.constant 0 : i32
    return %arg2, %arg1 : i32, i32
  }
  func.func @transform_2(%arg0: i32, %arg1: i32, %arg2: i32) -> (i32, i32) {
    %c0_i32 = arith.constant 0 : i32
    return %arg0, %arg1 : i32, i32
  }
}

</mosaic_0001>

<bundles_post_ra>
// kernel: tpu_custom_call.1
= control target key start
LH: loop header
LB: loop body
LE: loop exit
PB: predicated region body
PF: predicated region fallthrough
CT: control target
= control target key end

     0   :  { %7 = vsyncpa [#allocation4], 0  ;;  %s394_s0 = inlined_call_operand.hbm [shape: bf16[8,192], index: 0, kind: input, shape index: {}]   ;;  %s395_s1 = inlined_call_operand.hbm [shape: bf16[192,32], index: 1, kind: input, shape index: {}]   ;;  %s396_s2 = inlined_call_operand.hbm [shape: bf16[8,32], index: 2, kind: output, shape index: {}]  }
   0x1   :  { %8 = vsyncpa [#allocation7], 0 }
   0x2   :  { %9 = vsyncpa [#allocation5], 0  ;;  %s327_s9 = smov [#allocation3]   ;;  %s328_s11 = smov [#allocation6]  }
   0x3   :  { %s16_s10 = sshll.u32 %s327_s9, 4  ;;  %s25_s12 = sshll.u32 %s328_s11, 4  ;;  %s17_s10 = int_to_ptr.vmem [resolvable:$true] %s16_s10  ;;  %s349_s12 = int_to_ptr.vmem [resolvable:$true] %s25_s12 }
   0x4   :  { %s255_s15 = scalar_lea.hbm %s394_s0, 128 }
   0x5   :  { %p256_p0 = scmp.ne.s32.totalorder %s394_s0, %s255_s15  ;;  %p259_p1 = scmp.lt.u32.totalorder %s255_s15, %s394_s0 }
   0x7   :  { %p261_p2 = pnand %p259_p1, %p256_p0 }
   0x9   :  { %264 = shalt.err (!%p261_p2)
}
   0xa   :  { %s265_s20 = scalar_lea.vmem %s17_s10, 128  ;;  %p270_p4 = scmp.lt.s32.totalorder %s17_s10, %s17_s10 }
   0xb   :  { %p266_p3 = scmp.ne.s32.totalorder %s17_s10, %s265_s20  ;;  %p271_p5 = scmp.lt.s32.totalorder %s265_s20, %s265_s20 }
   0xd   :  { %p272_p6 = por %p271_p5, %p270_p4 }
   0xf   :  { %p273_p7 = pnand %p272_p6, %p266_p3 }
  0x11   :  { %276 = shalt.err (!%p273_p7)
}
  0x12   :  { %19 = dma.hbm_to_vmem [thread:$0]  %s394_s0, 128, %s17_s10, [#allocation4]  }
  0x13   :  { %s277_s25 = scalar_lea.hbm %s395_s1, 1536 }
  0x14   :  { %p278_p8 = scmp.ne.s32.totalorder %s395_s1, %s277_s25  ;;  %p281_p9 = scmp.lt.u32.totalorder %s277_s25, %s395_s1 }
  0x16   :  { %p283_p10 = pnand %p281_p9, %p278_p8 }
  0x18   :  { %286 = shalt.err (!%p283_p10)
}
  0x19   :  { %s287_s30 = scalar_lea.vmem %s349_s12, 1536  ;;  %p292_p12 = scmp.lt.s32.totalorder %s349_s12, %s349_s12 }
  0x1a   :  { %p288_p11 = scmp.ne.s32.totalorder %s349_s12, %s287_s30  ;;  %p293_p13 = scmp.lt.s32.totalorder %s287_s30, %s287_s30 }
  0x1c   :  { %p294_p0 = por %p293_p13, %p292_p12 }
  0x1e   :  { %p295_p1 = pnand %p294_p0, %p288_p11 }
  0x20   :  { %298 = shalt.err (!%p295_p1)
}
  0x21   :  { %s329_s0 = smov 64   ;;  %s330_s3 = smov 4  }
  0x22   :  { %31 = dma.hbm_to_vmem [thread:$0]  %s395_s1, 1536, %s349_s12, [#allocation7], %s329_s0, %s329_s0, %s330_s3  }
  0x23   :  { %321 = dma.done.wait [#allocation4], 128  }
  0x24   :  { %322 = vsyncadd [#allocation4], 4294967168 }
  0x25   :  { %323 = dma.done.wait [#allocation7], 1536  }
  0x26   :  { %324 = vsyncadd [#allocation7], 4294965760  ;;  %vm43_vm0 = vcmask 261120   ;;  %v331_v0 = vmov 0   ;;  %v332_v1 = vmov 0.0   ;;  %v241_v2 = vld [vmem:[#allocation6] sm:$0xff]  }
  0x27   :  { %153 = vmatprep.subr.bf16.mxu0 %v331_v0  ;;  %44 = vst.msk [vmem:[#allocation2] sm:$0xff] %vm43_vm0, %v332_v1  ;;  %v242_v3 = vld [vmem:[#allocation6 + $0x8] sm:$0xff]   ;;  %v243_v4 = vld [vmem:[#allocation6 + $0x10] sm:$0xff]   ;;  %v244_v5 = vld [vmem:[#allocation6 + $0x18] sm:$0xff]   ;;  %vm149_vm1 = vcmask 523264   ;;  %s333_s1 = smov [#allocation8]  }
  0x28   :  { %154 = vmatpush1.bf16.msra.mxu0 %v241_v2  ;;  %v45_v6 = vld [vmem:[#allocation3] sm:$0xff]  ;;  %v245_v8 = vld [vmem:[#allocation6 + $0x20] sm:$0xff]   ;;  %v246_v9 = vld [vmem:[#allocation6 + $0x28] sm:$0xff]   ;;  %s209_s6 = sshll.u32 %s333_s1, 4  ;;  %vm201_vm2 = vcmask 257024   ;;  %s210_s6 = int_to_ptr.vmem [resolvable:$true] %s209_s6 }
  0x29   :  { %155 = vmatprep.subr.bf16.mxu0 %v331_v0  ;;  %v220_v7 = vcombine.high %v45_v6, %v45_v6  ;;  %v247_v10 = vld [vmem:[#allocation6 + $0x30] sm:$0xff]   ;;  %v248_v11 = vld [vmem:[#allocation6 + $0x38] sm:$0xff]   ;;  %v249_v12 = vld [vmem:[#allocation6 + $0x40] sm:$0xff]   ;;  %v219_v16 = vcombine.low %v45_v6, %v45_v6  ;;  %s299_s7 = scalar_lea.vmem %s210_s6, 64  ;;  %p304_p3 = scmp.lt.s32.totalorder %s210_s6, %s210_s6 }
  0x2a   :  { %v250_v13 = vld [vmem:[#allocation6 + $0x48] sm:$0xff]   ;;  %v251_v14 = vld [vmem:[#allocation6 + $0x50] sm:$0xff]   ;;  %v252_v15 = vld [vmem:[#allocation6 + $0x58] sm:$0xff]   ;;  %p300_p2 = scmp.ne.s32.totalorder %s210_s6, %s299_s7  ;;  %p305_p4 = scmp.lt.s32.totalorder %s299_s7, %s299_s7 }
  0x2b   :  { %233 = vmatprep.mubr.msk.bf16.mxu0 %vm149_vm1, %v220_v7 }
  0x2c   :  { %156 = vmatpush1.bf16.msra.mxu0 %v242_v3  ;;  %p306_p5 = por %p305_p4, %p304_p3 }
  0x2d   :  { %157 = vmatprep.subr.bf16.mxu0 %v331_v0 }
  0x2e   :  { %v46_v17 = vld [vmem:[#allocation2] sm:$0xff]  ;;  %p307_p6 = pnand %p306_p5, %p300_p2 }
  0x30   :  { %158 = vmatpush1.bf16.msra.mxu0 %v243_v4 }
  0x31   :  { %159 = vmatprep.subr.bf16.mxu0 %v331_v0 }
  0x34   :  { %160 = vmatpush1.bf16.msra.mxu0 %v244_v5 }
  0x35   :  { %161 = vmatprep.subr.bf16.mxu0 %v331_v0 }
  0x38   :  { %162 = vmatpush1.bf16.msra.mxu0 %v245_v8 }
  0x39   :  { %163 = vmatprep.subr.bf16.mxu0 %v331_v0 }
  0x3c   :  { %164 = vmatpush1.bf16.msra.mxu0 %v246_v9 }
  0x3d   :  { %165 = vmatprep.subr.bf16.mxu0 %v331_v0 }
  0x40   :  { %166 = vmatpush1.bf16.msra.mxu0 %v247_v10 }
  0x41   :  { %167 = vmatprep.subr.bf16.mxu0 %v331_v0 }
  0x44   :  { %168 = vmatpush1.bf16.msra.mxu0 %v248_v11 }
  0x45   :  { %169 = vmatprep.subr.bf16.mxu0 %v331_v0 }
  0x48   :  { %170 = vmatpush1.bf16.msra.mxu0 %v249_v12 }
  0x49   :  { %171 = vmatprep.subr.bf16.mxu0 %v331_v0 }
  0x4c   :  { %172 = vmatpush1.bf16.msra.mxu0 %v250_v13 }
  0x4d   :  { %173 = vmatprep.subr.bf16.mxu0 %v331_v0 }
  0x50   :  { %174 = vmatpush1.bf16.msra.mxu0 %v251_v14 }
  0x51   :  { %175 = vmatprep.subr.bf16.mxu0 %v331_v0 }
  0x54   :  { %176 = vmatpush1.bf16.msra.mxu0 %v252_v15 }
  0x57   :  { %186 = vmatmul.mubr.bf16.vlgmr.msra.gmra.mrb[0].mxu0 %v219_v16 }
 0x12a   :  { %v187_v18 = vpop.f32.mrb[0].mxu0 }
 0x12b   :  { %v193_v19 = vadd.f32 %v187_v18, %v46_v17  ;;  %v189_v20 = vpop.f32.mrb[1].mxu0 }
 0x12c   :  { %v190_v21 = vpop.f32.mrb[2].mxu0 }
 0x12d   :  { %195 = vst.msk [vmem:[#allocation2] sm:$0xff] %vm43_vm0, %v193_v19  ;;  %v191_v22 = vpop.f32.mrb[3].mxu0 }
 0x134   :  { %v199_v23 = vld [vmem:[#allocation2] sm:$0xff] }
 0x135   :  { %v200_v24 = vpack.c.bf16 %v199_v23, %v199_v23 }
 0x137   :  { %202 = vst.msk [vmem:[#allocation8] sm:$0xf] %vm201_vm2, %v200_v24 }
 0x138   :  { %310 = shalt.err (!%p307_p6)
}
 0x139   :  { %s311_s10 = scalar_lea.hbm %s396_s2, 64 }
 0x13a   :  { %p312_p7 = scmp.ne.s32.totalorder %s396_s2, %s311_s10  ;;  %p315_p8 = scmp.lt.u32.totalorder %s311_s10, %s396_s2 }
 0x13c   :  { %p317_p9 = pnand %p315_p8, %p312_p7 }
 0x13e   :  { %320 = shalt.err (!%p317_p9)
}
 0x13f   :  { %212 = dma.vmem_to_hbm [thread:$0]  %s210_s6, 64, %s396_s2, [#allocation5]  }
 0x140   :  { %325 = dma.done.wait [#allocation5], 64  }
 0x141   :  { %326 = vsyncadd [#allocation5], 4294967232 }
 0x142   :  { %216 = vsyncpa [#allocation4], 1 }
 0x143   :  { %217 = vsyncpa [#allocation7], 1 }
 0x144   :  { %218 = vsyncpa [#allocation5], 1 }

</bundles_post_ra>
